<compile_context>
chip_gen: v5e
topology: v5e:2x2
jax: 0.10.0
libtpu: 0.0.40
codegen_flags: <defaults>
</compile_context>

<pallas_src>
from functools import partial

import jax
import jax.numpy as jnp
from jax.experimental import pallas as pl
from jax.experimental.pallas import tpu as pltpu


def _resblock_kernel(x_ref, w1_ref, s1_ref, b1_ref, w2_ref, s2_ref, b2_ref, o_ref):
    # x_ref : (B_blk*H, W*C)  f32 row-matrix block (channels folded into the lane axis)
    # w1_ref: (3, W*C, C1)    bf16 per-ky conv1 structured weights, C1 = (W-2)*Co
    # w2_ref: (3, C1, C2)     bf16 per-ky conv2 structured weights, C2 = (W-4)*Co
    # s*/b* : (1, C1|C2)      f32 folded BN(+conv-bias) scale / bias (tiled over columns)
    # o_ref : (B_blk, R2, C2) f32 cropped output rows, R2 = H-4
    Bblk, R2, C2 = o_ref.shape
    BH, WC = x_ref.shape
    C1 = w1_ref.shape[2]
    H = BH // Bblk
    Cch = (WC - C1) // 2          # channel count:  WC = W*C,  C1 = (W-2)*C
    M1 = BH - 2                   # conv1 rows (includes image-boundary garbage rows)
    M2 = BH - 4                   # conv2 rows

    x = x_ref[...]                # f32; also supplies the residual
    xb = x.astype(jnp.bfloat16)

    # ---- conv1 + BN1 + ReLU: 3 ky-shifted MXU matmuls, batch folded into M ----
    acc1 = jnp.zeros((M1, C1), jnp.float32)
    for ky in range(3):
        acc1 = acc1 + jnp.dot(xb[ky:ky + M1, :], w1_ref[ky],
                              preferred_element_type=jnp.float32)
    h1 = jnp.maximum(acc1 * s1_ref[...] + b1_ref[...], 0.0).astype(jnp.bfloat16)

    # ---- conv2 + BN2 + ReLU ----
    acc2 = jnp.zeros((M2, C2), jnp.float32)
    for ky in range(3):
        acc2 = acc2 + jnp.dot(h1[ky:ky + M2, :], w2_ref[ky],
                              preferred_element_type=jnp.float32)
    y = jnp.maximum(acc2 * s2_ref[...] + b2_ref[...], 0.0)

    # ---- + residual, per-image crop (boundary-garbage rows are never read) ----
    xr = x[:, 2 * Cch: 2 * Cch + C2]          # residual lanes (cols 2:W-2), sliced once
    for b in range(Bblk):
        o_ref[b] = y[b * H: b * H + R2, :] + xr[b * H + 2: b * H + 2 + R2, :]


def _shift_select(n_in, n_out):
    # S[kx, i, o] = 1.0 iff i == o + kx : encodes the kx taps of a 3-wide conv whose
    # output columns are restricted to the interior (column crop baked into the weights).
    i_idx = jnp.arange(n_in)[None, :, None]
    o_idx = jnp.arange(n_out)[None, None, :]
    k_idx = jnp.arange(3)[:, None, None]
    return (i_idx == o_idx + k_idx).astype(jnp.float32)


def prepare_resblock_params(params, H, W, C, eps=1e-5, mxu_dtype=jnp.bfloat16):
    """One-time preprocessing of module parameters into kernel-ready operands
    (hoisted out of the per-forward path)."""
    del H
    Co = params["w1"].shape[0]
    assert Co == C, "residual add requires out_ch == in_ch"

    w1_hwio = jnp.transpose(params["w1"], (2, 3, 1, 0)).astype(jnp.float32)  # (3,3,C,Co)
    w2_hwio = jnp.transpose(params["w2"], (2, 3, 1, 0)).astype(jnp.float32)  # (3,3,Co,Co)

    S1 = _shift_select(W, W - 2)       # (3, W,   W-2)
    S2 = _shift_select(W - 2, W - 4)   # (3, W-2, W-4)
    # per-ky structured row weights: w[ky][(in_col, ci), (out_col, co)]
    w1m = jnp.einsum('apq,yaic->ypiqc', S1, w1_hwio).reshape(3, W * C, (W - 2) * Co)
    w2m = jnp.einsum('apq,yaic->ypiqc', S2, w2_hwio).reshape(3, (W - 2) * Co, (W - 4) * Co)

    # fold conv bias + eval-mode BN: y = conv*s + ((cb - mean)*s + beta), s = g/sqrt(var+eps)
    def fold(cb, gamma, beta, rmean, rvar, ncols):
        s = gamma / jnp.sqrt(rvar + eps)
        b = (cb - rmean) * s + beta
        return (jnp.tile(s, (ncols,)).reshape(1, ncols * Co).astype(jnp.float32),
                jnp.tile(b, (ncols,)).reshape(1, ncols * Co).astype(jnp.float32))

    s1, b1 = fold(params["cb1"], params["g1"], params["be1"],
                  params["rm1"], params["rv1"], W - 2)
    s2, b2 = fold(params["cb2"], params["g2"], params["be2"],
                  params["rm2"], params["rv2"], W - 4)
    return (w1m.astype(mxu_dtype), s1, b1, w2m.astype(mxu_dtype), s2, b2)


def _choose_batch_block(N, H, mxu_rows=256):
    """Images per grid step: fill the MXU M axis (~B_blk*H rows) but keep >= 2 grid
    steps so ("parallel",) can shard the batch across v7x's two TensorCores."""
    target = max(1, -(-mxu_rows // H))
    b = min(N, target)
    if N > 1 and -(-N // b) < 2:
        b = max(1, -(-N // 2))
    return b


@partial(jax.jit, static_argnames=("b_blk",))
def resblock_nopadding_pallas(x_nchw, w1m, s1, b1, w2m, s2, b2, *, b_blk):
    """Forward of ResBlock_noPadding. x_nchw: (N, C, H, W) float32."""
    N, C, H, W = x_nchw.shape
    assert H >= 5 and W >= 5
    WC = W * C
    C1 = w1m.shape[2]
    C2 = w2m.shape[2]
    R2 = H - 4

    # NCHW -> (N, H, W*C) row matrix (lane-dense; no im2col copy), flattened over batch.
    x_rows = jnp.transpose(x_nchw, (0, 2, 3, 1)).astype(jnp.float32).reshape(N, H, WC)

    n_steps = -(-N // b_blk)
    Np = n_steps * b_blk
    if Np != N:
        x_rows = jnp.pad(x_rows, ((0, Np - N), (0, 0), (0, 0)))
    x_flat = x_rows.reshape(Np * H, WC)

    out_rows = pl.pallas_call(
        _resblock_kernel,
        out_shape=jax.ShapeDtypeStruct((Np, R2, C2), jnp.float32),
        grid_spec=pltpu.PrefetchScalarGridSpec(
            num_scalar_prefetch=0,
            grid=(n_steps,),
            in_specs=[
                pl.BlockSpec((b_blk * H, WC), lambda n: (n, 0)),
                pl.BlockSpec((3, WC, C1), lambda n: (0, 0, 0)),
                pl.BlockSpec((1, C1), lambda n: (0, 0)),
                pl.BlockSpec((1, C1), lambda n: (0, 0)),
                pl.BlockSpec((3, C1, C2), lambda n: (0, 0, 0)),
                pl.BlockSpec((1, C2), lambda n: (0, 0)),
                pl.BlockSpec((1, C2), lambda n: (0, 0)),
            ],
            out_specs=pl.BlockSpec((b_blk, R2, C2), lambda n: (n, 0, 0)),
        ),
        compiler_params=pltpu.CompilerParams(
            dimension_semantics=("parallel",),
            vmem_limit_bytes=32 * 1024 * 1024,
        ),
    )(x_flat, w1m, s1, b1, w2m, s2, b2)

    # (N, H-4, (W-4)*C) -> (N, C, H-4, W-4)   (pure layout plumbing; crop already done)
    out = out_rows[:N].reshape(N, R2, W - 4, C)
    return jnp.transpose(out, (0, 3, 1, 2))


def _reference_forward(x, params, eps=1e-5):
    """Pure-JAX reference matching the PyTorch module (eval-mode BN)."""
    def conv(x, w, b):
        y = jax.lax.conv_general_dilated(
            x, w, window_strides=(1, 1), padding=((1, 1), (1, 1)),
            dimension_numbers=("NCHW", "OIHW", "NCHW"))
        return y + b[None, :, None, None]

    def bn(x, g, be, rm, rv):
        return (g[None, :, None, None] * (x - rm[None, :, None, None])
                / jnp.sqrt(rv[None, :, None, None] + eps) + be[None, :, None, None])

    h = jax.nn.relu(bn(conv(x, params["w1"], params["cb1"]),
                       params["g1"], params["be1"], params["rm1"], params["rv1"]))
    h = jax.nn.relu(bn(conv(h, params["w2"], params["cb2"]),
                       params["g2"], params["be2"], params["rm2"], params["rv2"]))
    out = h + x
    return out[:, :, 2:-2, 2:-2]


def _make_params(key, in_ch, out_ch):
    ks = jax.random.split(key, 12)
    return {
        "w1": 0.1 * jax.random.normal(ks[0], (out_ch, in_ch, 3, 3), jnp.float32),
        "cb1": 0.1 * jax.random.normal(ks[1], (out_ch,), jnp.float32),
        "g1": 1.0 + 0.1 * jax.random.normal(ks[2], (out_ch,), jnp.float32),
        "be1": 0.1 * jax.random.normal(ks[3], (out_ch,), jnp.float32),
        "rm1": 0.1 * jax.random.normal(ks[4], (out_ch,), jnp.float32),
        "rv1": jax.random.uniform(ks[5], (out_ch,), jnp.float32, 0.5, 1.5),
        "w2": 0.1 * jax.random.normal(ks[6], (out_ch, out_ch, 3, 3), jnp.float32),
        "cb2": 0.1 * jax.random.normal(ks[7], (out_ch,), jnp.float32),
        "g2": 1.0 + 0.1 * jax.random.normal(ks[8], (out_ch,), jnp.float32),
        "be2": 0.1 * jax.random.normal(ks[9], (out_ch,), jnp.float32),
        "rm2": 0.1 * jax.random.normal(ks[10], (out_ch,), jnp.float32),
        "rv2": jax.random.uniform(ks[11], (out_ch,), jnp.float32, 0.5, 1.5),
    }


if __name__ == "__main__":
    key = jax.random.PRNGKey(0)
    kx, kp = jax.random.split(key)

    N, C, H, W = 8, 4, 16, 16  # in_ch == out_ch == 4 (required by the residual add)
    x = jax.random.normal(kx, (N, C, H, W), jnp.float32)
    params = _make_params(kp, C, C)

    # one-time preprocessing (cached outside the per-forward path)
    prepped = prepare_resblock_params(params, H, W, C)
    b_blk = _choose_batch_block(N, H)   # -> 4 images / grid step, 2 grid steps

    out = jax.block_until_ready(resblock_nopadding_pallas(x, *prepped, b_blk=b_blk))
    ref = jax.block_until_ready(_reference_forward(x, params))

    assert out.shape == (N, C, H - 4, W - 4), out.shape
    # bf16 MXU operands with f32 accumulation -> loosened tolerance (perf-review item)
    assert jnp.allclose(out, ref, atol=2e-2, rtol=2e-2), float(jnp.max(jnp.abs(out - ref)))
    print("KERNEL_OK")
</pallas_src>

<mosaic_0001>
module attributes {stable_mosaic.version = 11 : i64} {
  func.func @_resblock_kernel(%arg0: i32, %arg1: memref<64x64xf32, #tpu.memory_space<vmem>>, %arg2: memref<3x64x56xbf16, #tpu.memory_space<vmem>>, %arg3: memref<1x56xf32, #tpu.memory_space<vmem>>, %arg4: memref<1x56xf32, #tpu.memory_space<vmem>>, %arg5: memref<3x56x48xbf16, #tpu.memory_space<vmem>>, %arg6: memref<1x48xf32, #tpu.memory_space<vmem>>, %arg7: memref<1x48xf32, #tpu.memory_space<vmem>>, %arg8: memref<4x12x48xf32, #tpu.memory_space<vmem>>) attributes {dimension_semantics = [#tpu.dimension_semantics<parallel>], iteration_bounds = array<i64: 2>, scalar_prefetch = 0 : i64, scratch_operands = 0 : i64, tpu.core_type = #tpu.core_type<tc>, window_params = [{transform_indices = @transform_0, window_bounds = array<i64: 64, 64>}, {pipeline_mode = #tpu.pipeline_mode<synchronous>, transform_indices = @transform_1, window_bounds = array<i64: 3, 64, 56>}, {pipeline_mode = #tpu.pipeline_mode<synchronous>, transform_indices = @transform_2, window_bounds = array<i64: 1, 56>}, {pipeline_mode = #tpu.pipeline_mode<synchronous>, transform_indices = @transform_3, window_bounds = array<i64: 1, 56>}, {pipeline_mode = #tpu.pipeline_mode<synchronous>, transform_indices = @transform_4, window_bounds = array<i64: 3, 56, 48>}, {pipeline_mode = #tpu.pipeline_mode<synchronous>, transform_indices = @transform_5, window_bounds = array<i64: 1, 48>}, {pipeline_mode = #tpu.pipeline_mode<synchronous>, transform_indices = @transform_6, window_bounds = array<i64: 1, 48>}, {transform_indices = @transform_7, window_bounds = array<i64: 4, 12, 48>}]} {
    %c0 = arith.constant 0 : index
    %c0_0 = arith.constant 0 : index
    %0 = vector.load %arg1[%c0, %c0_0] : memref<64x64xf32, #tpu.memory_space<vmem>>, vector<64x64xf32>
    %1 = arith.truncf %0 : vector<64x64xf32> to vector<64x64xbf16>
    %cst = arith.constant 0.000000e+00 : f32
    %2 = vector.broadcast %cst : f32 to vector<62x56xf32>
    %3 = vector.extract_strided_slice %1 {offsets = [0, 0], sizes = [62, 64], strides = [1, 1]} : vector<64x64xbf16> to vector<62x64xbf16>
    %c0_1 = arith.constant 0 : index
    %c0_2 = arith.constant 0 : index
    %c0_3 = arith.constant 0 : index
    %4 = vector.load %arg2[%c0_1, %c0_2, %c0_3] : memref<3x64x56xbf16, #tpu.memory_space<vmem>>, vector<1x64x56xbf16>
    %5 = vector.shape_cast %4 : vector<1x64x56xbf16> to vector<64x56xbf16>
    %cst_4 = arith.constant dense<0.000000e+00> : vector<62x56xf32>
    %6 = tpu.matmul %3, %5, %cst_4 {dimension_numbers = #tpu.dot_dimension_numbers<[1], [0], [0], [1], [0, 0, 1, 1], [], []>} : vector<62x64xbf16>, vector<64x56xbf16>, vector<62x56xf32> -> vector<62x56xf32>
    %7 = arith.addf %2, %6 : vector<62x56xf32>
    %8 = vector.extract_strided_slice %1 {offsets = [1, 0], sizes = [62, 64], strides = [1, 1]} : vector<64x64xbf16> to vector<62x64xbf16>
    %c1 = arith.constant 1 : index
    %c0_5 = arith.constant 0 : index
    %c0_6 = arith.constant 0 : index
    %9 = vector.load %arg2[%c1, %c0_5, %c0_6] : memref<3x64x56xbf16, #tpu.memory_space<vmem>>, vector<1x64x56xbf16>
    %10 = vector.shape_cast %9 : vector<1x64x56xbf16> to vector<64x56xbf16>
    %cst_7 = arith.constant dense<0.000000e+00> : vector<62x56xf32>
    %11 = tpu.matmul %8, %10, %cst_7 {dimension_numbers = #tpu.dot_dimension_numbers<[1], [0], [0], [1], [0, 0, 1, 1], [], []>} : vector<62x64xbf16>, vector<64x56xbf16>, vector<62x56xf32> -> vector<62x56xf32>
    %12 = arith.addf %7, %11 : vector<62x56xf32>
    %13 = vector.extract_strided_slice %1 {offsets = [2, 0], sizes = [62, 64], strides = [1, 1]} : vector<64x64xbf16> to vector<62x64xbf16>
    %c2 = arith.constant 2 : index
    %c0_8 = arith.constant 0 : index
    %c0_9 = arith.constant 0 : index
    %14 = vector.load %arg2[%c2, %c0_8, %c0_9] : memref<3x64x56xbf16, #tpu.memory_space<vmem>>, vector<1x64x56xbf16>
    %15 = vector.shape_cast %14 : vector<1x64x56xbf16> to vector<64x56xbf16>
    %cst_10 = arith.constant dense<0.000000e+00> : vector<62x56xf32>
    %16 = tpu.matmul %13, %15, %cst_10 {dimension_numbers = #tpu.dot_dimension_numbers<[1], [0], [0], [1], [0, 0, 1, 1], [], []>} : vector<62x64xbf16>, vector<64x56xbf16>, vector<62x56xf32> -> vector<62x56xf32>
    %17 = arith.addf %12, %16 : vector<62x56xf32>
    %c0_11 = arith.constant 0 : index
    %c0_12 = arith.constant 0 : index
    %18 = vector.load %arg3[%c0_11, %c0_12] : memref<1x56xf32, #tpu.memory_space<vmem>>, vector<1x56xf32>
    %19 = vector.broadcast %18 : vector<1x56xf32> to vector<62x56xf32>
    %20 = arith.mulf %17, %19 : vector<62x56xf32>
    %c0_13 = arith.constant 0 : index
    %c0_14 = arith.constant 0 : index
    %21 = vector.load %arg4[%c0_13, %c0_14] : memref<1x56xf32, #tpu.memory_space<vmem>>, vector<1x56xf32>
    %22 = vector.broadcast %21 : vector<1x56xf32> to vector<62x56xf32>
    %23 = arith.addf %20, %22 : vector<62x56xf32>
    %cst_15 = arith.constant 0.000000e+00 : f32
    %24 = vector.broadcast %cst_15 : f32 to vector<62x56xf32>
    %25 = arith.maximumf %23, %24 : vector<62x56xf32>
    %26 = arith.truncf %25 : vector<62x56xf32> to vector<62x56xbf16>
    %cst_16 = arith.constant 0.000000e+00 : f32
    %27 = vector.broadcast %cst_16 : f32 to vector<60x48xf32>
    %28 = vector.extract_strided_slice %26 {offsets = [0, 0], sizes = [60, 56], strides = [1, 1]} : vector<62x56xbf16> to vector<60x56xbf16>
    %c0_17 = arith.constant 0 : index
    %c0_18 = arith.constant 0 : index
    %c0_19 = arith.constant 0 : index
    %29 = vector.load %arg5[%c0_17, %c0_18, %c0_19] : memref<3x56x48xbf16, #tpu.memory_space<vmem>>, vector<1x56x48xbf16>
    %30 = vector.shape_cast %29 : vector<1x56x48xbf16> to vector<56x48xbf16>
    %cst_20 = arith.constant dense<0.000000e+00> : vector<60x48xf32>
    %31 = tpu.matmul %28, %30, %cst_20 {dimension_numbers = #tpu.dot_dimension_numbers<[1], [0], [0], [1], [0, 0, 1, 1], [], []>} : vector<60x56xbf16>, vector<56x48xbf16>, vector<60x48xf32> -> vector<60x48xf32>
    %32 = arith.addf %27, %31 : vector<60x48xf32>
    %33 = vector.extract_strided_slice %26 {offsets = [1, 0], sizes = [60, 56], strides = [1, 1]} : vector<62x56xbf16> to vector<60x56xbf16>
    %c1_21 = arith.constant 1 : index
    %c0_22 = arith.constant 0 : index
    %c0_23 = arith.constant 0 : index
    %34 = vector.load %arg5[%c1_21, %c0_22, %c0_23] : memref<3x56x48xbf16, #tpu.memory_space<vmem>>, vector<1x56x48xbf16>
    %35 = vector.shape_cast %34 : vector<1x56x48xbf16> to vector<56x48xbf16>
    %cst_24 = arith.constant dense<0.000000e+00> : vector<60x48xf32>
    %36 = tpu.matmul %33, %35, %cst_24 {dimension_numbers = #tpu.dot_dimension_numbers<[1], [0], [0], [1], [0, 0, 1, 1], [], []>} : vector<60x56xbf16>, vector<56x48xbf16>, vector<60x48xf32> -> vector<60x48xf32>
    %37 = arith.addf %32, %36 : vector<60x48xf32>
    %38 = vector.extract_strided_slice %26 {offsets = [2, 0], sizes = [60, 56], strides = [1, 1]} : vector<62x56xbf16> to vector<60x56xbf16>
    %c2_25 = arith.constant 2 : index
    %c0_26 = arith.constant 0 : index
    %c0_27 = arith.constant 0 : index
    %39 = vector.load %arg5[%c2_25, %c0_26, %c0_27] : memref<3x56x48xbf16, #tpu.memory_space<vmem>>, vector<1x56x48xbf16>
    %40 = vector.shape_cast %39 : vector<1x56x48xbf16> to vector<56x48xbf16>
    %cst_28 = arith.constant dense<0.000000e+00> : vector<60x48xf32>
    %41 = tpu.matmul %38, %40, %cst_28 {dimension_numbers = #tpu.dot_dimension_numbers<[1], [0], [0], [1], [0, 0, 1, 1], [], []>} : vector<60x56xbf16>, vector<56x48xbf16>, vector<60x48xf32> -> vector<60x48xf32>
    %42 = arith.addf %37, %41 : vector<60x48xf32>
    %c0_29 = arith.constant 0 : index
    %c0_30 = arith.constant 0 : index
    %43 = vector.load %arg6[%c0_29, %c0_30] : memref<1x48xf32, #tpu.memory_space<vmem>>, vector<1x48xf32>
    %44 = vector.broadcast %43 : vector<1x48xf32> to vector<60x48xf32>
    %45 = arith.mulf %42, %44 : vector<60x48xf32>
    %c0_31 = arith.constant 0 : index
    %c0_32 = arith.constant 0 : index
    %46 = vector.load %arg7[%c0_31, %c0_32] : memref<1x48xf32, #tpu.memory_space<vmem>>, vector<1x48xf32>
    %47 = vector.broadcast %46 : vector<1x48xf32> to vector<60x48xf32>
    %48 = arith.addf %45, %47 : vector<60x48xf32>
    %cst_33 = arith.constant 0.000000e+00 : f32
    %49 = vector.broadcast %cst_33 : f32 to vector<60x48xf32>
    %50 = arith.maximumf %48, %49 : vector<60x48xf32>
    %51 = vector.extract_strided_slice %0 {offsets = [0, 8], sizes = [64, 48], strides = [1, 1]} : vector<64x64xf32> to vector<64x48xf32>
    %52 = vector.extract_strided_slice %50 {offsets = [0, 0], sizes = [12, 48], strides = [1, 1]} : vector<60x48xf32> to vector<12x48xf32>
    %53 = vector.extract_strided_slice %51 {offsets = [2, 0], sizes = [12, 48], strides = [1, 1]} : vector<64x48xf32> to vector<12x48xf32>
    %54 = arith.addf %52, %53 : vector<12x48xf32>
    %c0_34 = arith.constant 0 : index
    %c0_35 = arith.constant 0 : index
    %c0_36 = arith.constant 0 : index
    %55 = vector.load %arg8[%c0_34, %c0_35, %c0_36] : memref<4x12x48xf32, #tpu.memory_space<vmem>>, vector<1x12x48xf32>
    %56 = vector.shape_cast %55 : vector<1x12x48xf32> to vector<12x48xf32>
    %57 = vector.shape_cast %54 : vector<12x48xf32> to vector<1x12x48xf32>
    tpu.vector_store %arg8[%c0_34, %c0_35, %c0_36], %57 {strides = array<i32>} : memref<4x12x48xf32, #tpu.memory_space<vmem>>, vector<1x12x48xf32>,
    %58 = vector.extract_strided_slice %50 {offsets = [16, 0], sizes = [12, 48], strides = [1, 1]} : vector<60x48xf32> to vector<12x48xf32>
    %59 = vector.extract_strided_slice %51 {offsets = [18, 0], sizes = [12, 48], strides = [1, 1]} : vector<64x48xf32> to vector<12x48xf32>
    %60 = arith.addf %58, %59 : vector<12x48xf32>
    %c1_37 = arith.constant 1 : index
    %c0_38 = arith.constant 0 : index
    %c0_39 = arith.constant 0 : index
    %61 = vector.load %arg8[%c1_37, %c0_38, %c0_39] : memref<4x12x48xf32, #tpu.memory_space<vmem>>, vector<1x12x48xf32>
    %62 = vector.shape_cast %61 : vector<1x12x48xf32> to vector<12x48xf32>
    %63 = vector.shape_cast %60 : vector<12x48xf32> to vector<1x12x48xf32>
    tpu.vector_store %arg8[%c1_37, %c0_38, %c0_39], %63 {strides = array<i32>} : memref<4x12x48xf32, #tpu.memory_space<vmem>>, vector<1x12x48xf32>,
    %64 = vector.extract_strided_slice %50 {offsets = [32, 0], sizes = [12, 48], strides = [1, 1]} : vector<60x48xf32> to vector<12x48xf32>
    %65 = vector.extract_strided_slice %51 {offsets = [34, 0], sizes = [12, 48], strides = [1, 1]} : vector<64x48xf32> to vector<12x48xf32>
    %66 = arith.addf %64, %65 : vector<12x48xf32>
    %c2_40 = arith.constant 2 : index
    %c0_41 = arith.constant 0 : index
    %c0_42 = arith.constant 0 : index
    %67 = vector.load %arg8[%c2_40, %c0_41, %c0_42] : memref<4x12x48xf32, #tpu.memory_space<vmem>>, vector<1x12x48xf32>
    %68 = vector.shape_cast %67 : vector<1x12x48xf32> to vector<12x48xf32>
    %69 = vector.shape_cast %66 : vector<12x48xf32> to vector<1x12x48xf32>
    tpu.vector_store %arg8[%c2_40, %c0_41, %c0_42], %69 {strides = array<i32>} : memref<4x12x48xf32, #tpu.memory_space<vmem>>, vector<1x12x48xf32>,
    %70 = vector.extract_strided_slice %50 {offsets = [48, 0], sizes = [12, 48], strides = [1, 1]} : vector<60x48xf32> to vector<12x48xf32>
    %71 = vector.extract_strided_slice %51 {offsets = [50, 0], sizes = [12, 48], strides = [1, 1]} : vector<64x48xf32> to vector<12x48xf32>
    %72 = arith.addf %70, %71 : vector<12x48xf32>
    %c3 = arith.constant 3 : index
    %c0_43 = arith.constant 0 : index
    %c0_44 = arith.constant 0 : index
    %73 = vector.load %arg8[%c3, %c0_43, %c0_44] : memref<4x12x48xf32, #tpu.memory_space<vmem>>, vector<1x12x48xf32>
    %74 = vector.shape_cast %73 : vector<1x12x48xf32> to vector<12x48xf32>
    %75 = vector.shape_cast %72 : vector<12x48xf32> to vector<1x12x48xf32>
    tpu.vector_store %arg8[%c3, %c0_43, %c0_44], %75 {strides = array<i32>} : memref<4x12x48xf32, #tpu.memory_space<vmem>>, vector<1x12x48xf32>,
    return
  }
  func.func @transform_0(%arg0: i32) -> (i32, i32) {
    %c0_i32 = arith.constant 0 : i32
    %c0_i32_0 = arith.constant 0 : i32
    return %arg0, %c0_i32 : i32, i32
  }
  func.func @transform_1(%arg0: i32) -> (i32, i32, i32) {
    %c0_i32 = arith.constant 0 : i32
    %c0_i32_0 = arith.constant 0 : i32
    %c0_i32_1 = arith.constant 0 : i32
    %c0_i32_2 = arith.constant 0 : i32
    return %c0_i32, %c0_i32_0, %c0_i32_1 : i32, i32, i32
  }
  func.func @transform_2(%arg0: i32) -> (i32, i32) {
    %c0_i32 = arith.constant 0 : i32
    %c0_i32_0 = arith.constant 0 : i32
    %c0_i32_1 = arith.constant 0 : i32
    return %c0_i32, %c0_i32_0 : i32, i32
  }
  func.func @transform_3(%arg0: i32) -> (i32, i32) {
    %c0_i32 = arith.constant 0 : i32
    %c0_i32_0 = arith.constant 0 : i32
    %c0_i32_1 = arith.constant 0 : i32
    return %c0_i32, %c0_i32_0 : i32, i32
  }
  func.func @transform_4(%arg0: i32) -> (i32, i32, i32) {
    %c0_i32 = arith.constant 0 : i32
    %c0_i32_0 = arith.constant 0 : i32
    %c0_i32_1 = arith.constant 0 : i32
    %c0_i32_2 = arith.constant 0 : i32
    return %c0_i32, %c0_i32_0, %c0_i32_1 : i32, i32, i32
  }
  func.func @transform_5(%arg0: i32) -> (i32, i32) {
    %c0_i32 = arith.constant 0 : i32
    %c0_i32_0 = arith.constant 0 : i32
    %c0_i32_1 = arith.constant 0 : i32
    return %c0_i32, %c0_i32_0 : i32, i32
  }
  func.func @transform_6(%arg0: i32) -> (i32, i32) {
    %c0_i32 = arith.constant 0 : i32
    %c0_i32_0 = arith.constant 0 : i32
    %c0_i32_1 = arith.constant 0 : i32
    return %c0_i32, %c0_i32_0 : i32, i32
  }
  func.func @transform_7(%arg0: i32) -> (i32, i32, i32) {
    %c0_i32 = arith.constant 0 : i32
    %c0_i32_0 = arith.constant 0 : i32
    %c0_i32_1 = arith.constant 0 : i32
    return %arg0, %c0_i32, %c0_i32_0 : i32, i32, i32
  }
}

</mosaic_0001>

<bundles_post_ra>
// kernel: resblock_nopadding_pallas.1
= control target key start
LH: loop header
LB: loop body
LE: loop exit
PB: predicated region body
PF: predicated region fallthrough
CT: control target
= control target key end

     0   :  { %s1313_s24 = smov 0   ;;  %s1579_s0 = inlined_call_operand.vmem [shape: f32[128,64], index: 0, kind: input, shape index: {}]   ;;  %s1580_s1 = inlined_call_operand.vmem [shape: bf16[3,64,56], index: 1, kind: input, shape index: {}]   ;;  %s1581_s2 = inlined_call_operand.vmem [shape: f32[1,56], index: 2, kind: input, shape index: {}]   ;;  %s1582_s3 = inlined_call_operand.vmem [shape: f32[1,56], index: 3, kind: input, shape index: {}]   ;;  %s1583_s4 = inlined_call_operand.vmem [shape: bf16[3,56,48], index: 4, kind: input, shape index: {}]   ;;  %s1584_s5 = inlined_call_operand.vmem [shape: f32[1,48], index: 5, kind: input, shape index: {}]   ;;  %s1585_s6 = inlined_call_operand.vmem [shape: f32[1,48], index: 6, kind: input, shape index: {}]   ;;  %s1586_s7 = inlined_call_operand.vmem [shape: f32[8,12,48], index: 7, kind: output, shape index: {}]  }
   0x1 LB: > { %s1065_s25 = sadd.s32 4294967295, %s1270_s24   ;;  %p1069_p0 = scmp.ge.s32.totalorder %s1270_s24, 1  ;;  %s1270_s24 = sphi %s1313_s24, %s17_s24  }
   0x2   : > { %p238_p1 = scmp.lt.s32.totalorder %s1270_s24, 3 }
   0x4   : > { %p239_p2 = pnand %p1069_p0, %p238_p1 }
   0x5   : > { %s1070_s30 = sshll.u32 (!%p239_p2), %s1065_s25, 3  ;;  %s1272_s18 = smov (!%p239_p2), 120  }
   0x6   : > { %242 = sbr.rel (%p239_p2) target bundleno = 437 (0x1b5), region = 48  ;;  %p272_p3 = scmp.lt.s32.totalorder (!%p239_p2), %s1070_s30, 15 }
   0xb   : > { %v1229_v0 = vld [vmem:[%s1580_s1 + $0x38] sm:$0xff]  ;;  %v1228_v2 = vld [vmem:[%s1580_s1 + $0x30] sm:$0xff]  ;;  %s1588_s30 = smov (!%p272_p3, %s1070_s30), 15  ;;  %v1227_v4 = vld [vmem:[%s1580_s1 + $0x28] sm:$0xff]  ;;  %vm394_vm0 = vcmask 523264   ;;  %vm506_vm2 = vcmask 1046528  }
   0xc   : > { %v1225_v1 = vld [vmem:[%s1580_s1 + $0x18] sm:$0xff]  ;;  %1243 = vmatpush.bf16.msra.mxu2 %v1229_v0  ;;  %v1224_v3 = vld [vmem:[%s1580_s1 + $0x10] sm:$0xff]  ;;  %411 = vmatpush.bf16.msra.mxu0 %v1229_v0  ;;  %s1071_s12 = sshll.u32 %s1588_s30, 3  ;;  %v1223_v5 = vld [vmem:[%s1580_s1 + $0x8] sm:$0xff]  ;;  %vm338_vm1 = vsmask.f32 7424 }
   0xd   : > { %1247 = vmatpush.bf16.msra.mxu3 %v1225_v1  ;;  %472 = vmatpush.bf16.msra.mxu1 %v1225_v1  ;;  %s275_s19 = scalar_lea.vmem %s1579_s0, %s1071_s12  ;;  %v1226_v20 = vld [vmem:[%s1580_s1 + $0x20] sm:$0xff]  ;;  %v1233_v27 = vld [vmem:[%s1580_s1 + $0x58] sm:$0xff]  ;;  %v1232_v39 = vld [vmem:[%s1580_s1 + $0x50] sm:$0xff]  ;;  %vm727_vm3 = vcmask 1043456   ;;  %vm714_vm4 = vcmask 457728   ;;  %vm943_vm5 = vcmask 1045504  }
   0xe   : > { %v1344_v6 = vld [vmem:[%s275_s19 + $0x20] sm:$0xff]  ;;  %v1346_v7 = vld [vmem:[%s275_s19 + $0x28] sm:$0xff]  ;;  %v1348_v8 = vld [vmem:[%s275_s19 + $0x30] sm:$0xff]  ;;  %vm955_vm6 = vcmask 392192   ;;  %vm957_vm7 = vcmask 388096  }
   0xf   : > { %v1350_v9 = vld [vmem:[%s275_s19 + $0x38] sm:$0xff]  ;;  %v297_v10 = vpack.c.bf16 %v1344_v6, %v1344_v6  ;;  %v298_v11 = vpack.c.bf16 %v1346_v7, %v1346_v7  ;;  %v299_v12 = vpack.c.bf16 %v1348_v8, %v1348_v8  ;;  %v1358_v13 = vld [vmem:[%s275_s19] sm:$0xff]  ;;  %v1360_v14 = vld [vmem:[%s275_s19 + $0x8] sm:$0xff] }
  0x10   : > { %1244 = vmatpush.bf16.msra.mxu2 %v1228_v2  ;;  %412 = vmatpush.bf16.msra.mxu0 %v1228_v2  ;;  %v300_v15 = vpack.c.bf16 %v1350_v9, %v1350_v9  ;;  %v1364_v16 = vld [vmem:[%s275_s19 + $0x10] sm:$0xff]  ;;  %v1366_v17 = vld [vmem:[%s275_s19 + $0x18] sm:$0xff]  ;;  %v293_v18 = vpack.c.bf16 %v1358_v13, %v1358_v13  ;;  %v294_v19 = vpack.c.bf16 %v1360_v14, %v1360_v14  ;;  %v1222_v21 = vld [vmem:[%s1580_s1] sm:$0xff]  ;;  %s1072_s19 = sshll.u32 %s1065_s25, 2 }
  0x11   : > { %1248 = vmatpush.bf16.msra.mxu3 %v1224_v3  ;;  %473 = vmatpush.bf16.msra.mxu1 %v1224_v3  ;;  %v330_v22 = vunpack.c.l.b16 %v297_v10  ;;  %v331_v23 = vunpack.c.l.b16 %v298_v11  ;;  %v332_v24 = vunpack.c.l.b16 %v299_v12  ;;  %v295_v25 = vpack.c.bf16 %v1364_v16, %v1364_v16  ;;  %v1231_v48 = vld [vmem:[%s1580_s1 + $0x48] sm:$0xff]  ;;  %v1230_v53 = vld [vmem:[%s1580_s1 + $0x40] sm:$0xff]  ;;  %v633_v3 = vld [vmem:[%s1583_s4 + $0x18] sm:$0xf]  ;;  %p278_p4 = scmp.lt.s32.totalorder %s1072_s19, 7 }
  0x12   : > { %v333_v26 = vunpack.c.l.b16 %v300_v15  ;;  %v296_v28 = vpack.c.bf16 %v1366_v17, %v1366_v17  ;;  %v326_v29 = vunpack.c.l.b16 %v293_v18  ;;  %v327_v30 = vunpack.c.l.b16 %v294_v19  ;;  %v1236_v12 = vld [vmem:[%s1583_s4 + $0x10] sm:$0xff]  ;;  %v1235_v15 = vld [vmem:[%s1583_s4 + $0x8] sm:$0xff]  ;;  %v1234_v19 = vld [vmem:[%s1583_s4] sm:$0xff] }
  0x13   : > { %v336_v31 = vpack.c.b16 %v331_v23, %v330_v22  ;;  %v328_v32 = vunpack.c.l.b16 %v295_v25  ;;  %v1196_v23 = vld [vmem:[%s1583_s4 + $0x50] sm:$0xf]  ;;  %s1590_s19 = smov (!%p278_p4, %s1072_s19), 7 }
  0x14   : > { %1245 = vmatpush.bf16.msra.mxu2 %v1227_v4  ;;  %413 = vmatpush.bf16.msra.mxu0 %v1227_v4  ;;  %v337_v33 = vpack.c.b16 %v333_v26, %v332_v24  ;;  %v329_v34 = vunpack.c.l.b16 %v296_v28  ;;  %v334_v35 = vpack.c.b16 %v327_v30, %v326_v29  ;;  %v773_v4 = vunpack.c.l.b16 %v633_v3  ;;  %s1221_s25 = sshll.u32 %s1590_s19, 4 }
  0x15   : > { %1249 = vmatpush.bf16.msra.mxu3 %v1223_v5  ;;  %474 = vmatpush.bf16.msra.mxu1 %v1223_v5  ;;  %v355_v36 = vshll.u32 %v336_v31, 16  ;;  %v359_v37 = vshrl.u32 %v336_v31, 16  ;;  %v510_v62 = vrot.slane %v336_v31, 1  ;;  %v849_v26 = vunpack.c.l.b16 %v1196_v23  ;;  %s1544_s28 = scalar_lea.vmem %s1586_s7, %s1221_s25 }
  0x16   : > { %v363_v38 = vshll.u32 %v337_v33, 16  ;;  %v335_v40 = vpack.c.b16 %v329_v34, %v328_v32  ;;  %v340_v42 = vshrl.u32 %v334_v35, 16  ;;  %v342_v43 = vshll.u32 %v334_v35, 16 }
  0x17   : > { %v357_v41 = vrot.slane %v355_v36, 1  ;;  %v367_v55 = vshrl.u32 %v337_v33, 16  ;;  %v507_v59 = vrot.slane %v334_v35, 1  ;;  %v512_v0 = vrot.slane %v337_v33, 1 }
  0x18   : > { %1246 = vmatpush.bf16.msra.mxu2 %v1226_v20  ;;  %414 = vmatpush.bf16.msra.mxu0 %v1226_v20  ;;  %v365_v44 = vrot.slane %v363_v38, 1  ;;  %v347_v45 = vshll.u32 %v335_v40, 16  ;;  %v344_v47 = vrot.slane %v342_v43, 1  ;;  %v351_v54 = vshrl.u32 %v335_v40, 16  ;;  %v1157_v20 = vld [vmem:[%s1583_s4 + $0x34] sm:$0xf] }
  0x19   : > { %1250 = vmatpush.bf16.msra.mxu3 %v1222_v21  ;;  %475 = vmatpush.bf16.msra.mxu1 %v1222_v21  ;;  %v361_v46 = vor.u32 %v359_v37, %v357_v41  ;;  %v508_v60 = vrot.slane %v335_v40, 1  ;;  %v513_v1 = vsel %vm506_vm2, %v510_v62, %v512_v0  ;;  %v777_v5 = vpack.c.b16 %v773_v4, %v773_v4  ;;  %v1240_v43 = vld [vmem:[%s1583_s4 + $0x38] sm:$0xff] }
  0x1a   : > { %v349_v49 = vrot.slane %v347_v45, 1  ;;  %v345_v51 = vor.u32 %v344_v47, %v340_v42  ;;  %v369_v57 = vor.u32 %v367_v55, %v365_v44  ;;  %v706_v21 = vunpack.c.l.b16 %v1157_v20  ;;  %v1238_v42 = vld [vmem:[%s1583_s4 + $0x24] sm:$0xff] }
  0x1b   : > { %v366_v50 = vsel %vm338_vm1, %v361_v46, %v365_v44  ;;  %v509_v61 = vsel %vm506_vm2, %v507_v59, %v508_v60  ;;  %v511_v63 = vsel %vm506_vm2, %v508_v60, %v510_v62  ;;  %v790_v10 = vsel %vm727_vm3, %v777_v5, 0  ;;  %v1237_v46 = vld [vmem:[%s1583_s4 + $0x1c] sm:$0xff] }
  0x1c   : > { %554 = vmatpush.bf16.msrb.mxu2 %v1233_v27  ;;  %1121 = vmatmul.msk.bf16.vlgmr.msra.gmra.mxu3 %vm394_vm0, %v336_v31  ;;  %v350_v52 = vsel %vm338_vm1, %v345_v51, %v349_v49  ;;  %v353_v56 = vor.u32 %v351_v54, %v349_v49  ;;  %v710_v25 = vpack.c.b16 %v706_v21, %v706_v21  ;;  %v1239_v31 = vld [vmem:[%s1583_s4 + $0x2c] sm:$0xff]  ;;  %v945_v21 = vrot.slane %v1360_v14, 2 }
  0x1d   : > { %1119 = vmatmul.msk.bf16.vlgmr.msra.gmra.mxu1 %vm394_vm0, %v334_v35  ;;  %1101 = vmatmul.msk.bf16.vlgmr.msra.gmra.mxu2 %vm394_vm0, %v366_v50  ;;  %v853_v29 = vpack.c.b16 %v849_v26, %v849_v26  ;;  %v1450_v35 = vld [vmem:[%s1581_s2] ss:$0 sm:$0xff] }
  0x1e   : > { %1099 = vmatmul.msk.bf16.vlgmr.msra.gmra.mxu0 %vm394_vm0, %v350_v52  ;;  %v358_v58 = vsel %vm338_vm1, %v353_v56, %v357_v41  ;;  %v729_v28 = vsel %vm727_vm3, %v710_v25, 0  ;;  %v1459_v41 = vld [vmem:[%s1582_s3] ss:$0 sm:$0xff]  ;;  %949 = vrot.lane.b32.xlu0 %v945_v21, %s1272_s18 }
  0x1f   : > { %796 = vmatpush.bf16.msrb.mxu0 %v790_v10  ;;  %735 = vmatpush.bf16.msrb.mxu3 %v729_v28  ;;  %v870_v30 = vsel %vm727_vm3, %v853_v29, 0 }
  0x20   : > { %555 = vmatpush.bf16.msrb.mxu2 %v1232_v39  ;;  %876 = vmatpush.bf16.msrb.mxu1 %v870_v30  ;;  %v1241_v39 = vld [vmem:[%s1583_s4 + $0x40] sm:$0xff] }
  0x23   : > { %797 = vmatpush.bf16.msrb.mxu0 %v1236_v12  ;;  %736 = vmatpush.bf16.msrb.mxu3 %v1239_v31 }
  0x24   : > { %556 = vmatpush.bf16.msrb.mxu2 %v1231_v48 }
  0x27   : > { %798 = vmatpush.bf16.msrb.mxu0 %v1235_v15  ;;  %737 = vmatpush.bf16.msrb.mxu3 %v1238_v42 }
  0x28   : > { %557 = vmatpush.bf16.msrb.mxu2 %v1230_v53 }
  0x2b   : > { %799 = vmatpush.bf16.msrb.mxu0 %v1234_v19  ;;  %738 = vmatpush.bf16.msrb.mxu3 %v1237_v46 }
  0x2c   : > { %1122 = vmatmul.msk.bf16.gmra.mxu3 %vm394_vm0, %v337_v33  ;;  %v1242_v33 = vld [vmem:[%s1583_s4 + $0x48] sm:$0xff] }
  0x2d   : > { %1120 = vmatmul.msk.bf16.gmra.mxu1 %vm394_vm0, %v335_v40  ;;  %1102 = vmatmul.msk.bf16.gmra.mxu2 %vm394_vm0, %v369_v57 }
  0x2e   : > { %1100 = vmatmul.msk.bf16.gmra.mxu0 %vm394_vm0, %v358_v58  ;;  %877 = vmatpush.bf16.msrb.mxu1 %v1242_v33 }
  0x32   : > { %878 = vmatpush.bf16.msrb.mxu1 %v1241_v39 }
  0x36   : > { %879 = vmatpush.bf16.msrb.mxu1 %v1240_v43 }
  0x3d   : > { %1147 = vmatmul.msk.bf16.vlgmr.msrb.gmra.mxu2 %vm394_vm0, %v509_v61 }
  0x4d   : > { %1148 = vmatmul.msk.bf16.gmra.mxu2 %vm394_vm0, %v511_v63 }
  0x5d   : > { %1149 = vmatmul.msk.bf16.gmra.mxu2 %vm394_vm0, %v513_v1 }
  0x6d   : > { %1150 = vmatmul.msk.bf16.gmra.mxu2 %vm394_vm0, %v512_v0 }
  0x9a   : > { %v477_v22 = vpop.f32.mrf.mxu1 }
  0x9b   : > { %v416_v24 = vpop.f32.mrf.mxu0 }
  0x9c   : > { %v478_v32 = vadd.f32 %v477_v22, %v416_v24 }
  0x9f   : > { %v487_v1 = vpop.f32.mrf.mxu3 }
  0xa0   : > { %v1412_v2 = vpop.f32.mrf.mxu2 }
  0xa1   : > { %v488_v23 = vadd.f32 %v487_v1, %v1412_v2 }
  0xa2   : > { %v479_v34 = vpop.f32.mrf.mxu1 }
  0xa3   : > { %v418_v36 = vpop.f32.mrf.mxu0 }
  0xa4   : > { %v480_v44 = vadd.f32 %v479_v34, %v418_v36  ;;  %v944_v34 = vrot.slane %v1358_v13, 2 }
  0xa6   : > { %v946_v2 = vsel %vm943_vm5, %v944_v34, %v945_v21 }
  0xa7   : > { %v489_v24 = vpop.f32.mrf.mxu3  ;;  %947 = vrot.lane.b32.xlu0 %v946_v2, %s1272_s18 }
  0xa8   : > { %v1418_v11 = vpop.f32.mrf.mxu2 }
  0xaa   : > { %v482_v50 = vpop.f32.mrf.mxu1 }
  0xab   : > { %v421_v49 = vpop.f32.mrf.mxu0 }
  0xac   : > { %v483_v53 = vadd.f32 %v482_v50, %v421_v49 }
  0xb0   : > { %v1426_v18 = vpop.f32.mrf.mxu2 }
  0xb2   : > { %v484_v0 = vpop.f32.mrf.mxu1 }
  0xb3   : > { %v423_v63 = vpop.f32.mrf.mxu0 }
  0xb4   : > { %v485_v5 = vadd.f32 %v484_v0, %v423_v63 }
  0xb8   : > { %v1437_v27 = vpop.f32.mrf.mxu2 }
  0xc0   : > { %v559_v37 = vpop.f32.mrf.mxu2 }
  0xc1   : > { %v579_v38 = vadd.f32 %v559_v37, %v478_v32  ;;  %v490_v37 = vadd.f32 %v489_v24, %v1418_v11  ;;  %v977_v24 = vrot.slane %v1344_v6, 2 }
  0xc3   : > { %v591_v40 = vmul.f32 %v1450_v35, %v579_v38 }
  0xc5   : > { %v603_v45 = vadd.f32 %v1459_v41, %v591_v40 }
  0xc7   : > { %v611_v51 = vmax.f32 %v603_v45, 0.0  ;;  %v492_v45 = vpop.f32.mrf.mxu3 }
  0xc8   : > { %v561_v47 = vpop.f32.mrf.mxu2 }
  0xc9   : > { %v580_v48 = vadd.f32 %v561_v47, %v480_v44  ;;  %v619_v55 = vpack.c.bf16 %v611_v51, %v611_v51  ;;  %v962_v51 = vrot.slane %v1366_v17, 2 }
  0xcb   : > { %v592_v52 = vmul.f32 %v1450_v35, %v580_v48  ;;  %v650_v60 = vunpack.c.l.b16 %v619_v55  ;;  %966 = vrot.lane.b32.xlu1 %v962_v51, %s1272_s18 }
  0xcd   : > { %v604_v54 = vadd.f32 %v1459_v41, %v592_v52 }
  0xcf   : > { %v612_v56 = vmax.f32 %v604_v54, 0.0 }
  0xd0   : > { %v564_v57 = vpop.f32.mrf.mxu2 }
  0xd1   : > { %v620_v58 = vpack.c.bf16 %v612_v56, %v612_v56  ;;  %v581_v59 = vadd.f32 %v564_v57, %v483_v53  ;;  %v493_v53 = vadd.f32 %v492_v45, %v1426_v18  ;;  %v961_v56 = vrot.slane %v1364_v16, 2 }
  0xd3   : > { %v651_v61 = vunpack.c.l.b16 %v620_v58  ;;  %v593_v62 = vmul.f32 %v1450_v35, %v581_v59  ;;  %v963_v17 = vsel %vm943_vm5, %v961_v56, %v962_v51 }
  0xd4   : > { %964 = vrot.lane.b32.xlu1 %v963_v17, %s1272_s18 }
  0xd5   : > { %v658_v3 = vpack.c.b16 %v651_v61, %v650_v60  ;;  %v605_v4 = vadd.f32 %v1459_v41, %v593_v62  ;;  %v494_v60 = vpop.f32.mrf.mxu3 }
  0xd6   : > { %v495_v1 = vadd.f32 %v494_v60, %v1437_v27 }
  0xd7   : > { %1186 = vmatmul.msk.bf16.vlgmr.msrb.gmra.mxu0 %vm714_vm4, %v658_v3  ;;  %v613_v15 = vmax.f32 %v605_v4, 0.0  ;;  %v665_v30 = vshll.u32 %v658_v3, 16  ;;  %v829_v38 = vrot.slane %v658_v3, 1  ;;  %v663_v42 = vshrl.u32 %v658_v3, 16 }
  0xd8   : > { %v566_v10 = vpop.f32.mrf.mxu2 }
  0xd9   : > { %v582_v12 = vadd.f32 %v566_v10, %v485_v5  ;;  %v621_v22 = vpack.c.bf16 %v613_v15, %v613_v15  ;;  %v667_v36 = vrot.slane %v665_v30, 1 }
  0xdb   : > { %v594_v19 = vmul.f32 %v1450_v35, %v582_v12  ;;  %v652_v31 = vunpack.c.l.b16 %v621_v22  ;;  %v668_v47 = vor.u32 %v667_v36, %v663_v42  ;;  %v993_v22 = vrot.slane %v1348_v8, 2  ;;  %v950_v42 = vpop.permute.xlu0 %949 }
  0xdd   : > { %v606_v20 = vadd.f32 %v1459_v41, %v594_v19 }
  0xdf   : > { %v614_v25 = vmax.f32 %v606_v20, 0.0 }
  0xe0   : > { %v569_v26 = vpop.f32.mrf.mxu2 }
  0xe1   : > { %v622_v28 = vpack.c.bf16 %v614_v25, %v614_v25  ;;  %v583_v29 = vadd.f32 %v569_v26, %v488_v23  ;;  %v994_v23 = vrot.slane %v1350_v9, 2  ;;  %v978_v25 = vrot.slane %v1346_v7, 2 }
  0xe3   : > { %v653_v32 = vunpack.c.l.b16 %v622_v28  ;;  %v595_v33 = vmul.f32 %v1450_v35, %v583_v29  ;;  %v995_v28 = vsel %vm943_vm5, %v993_v22, %v994_v23  ;;  %v979_v29 = vsel %vm943_vm5, %v977_v24, %v978_v25  ;;  %998 = vrot.lane.b32.xlu1 %v994_v23, %s1272_s18 }
  0xe4   : > { %996 = vrot.lane.b32.xlu0 %v995_v28, %s1272_s18  ;;  %980 = vrot.lane.b32.xlu2 %v979_v29, %s1272_s18 }
  0xe5   : > { %v659_v14 = vpack.c.b16 %v653_v32, %v652_v31  ;;  %v607_v39 = vadd.f32 %v1459_v41, %v595_v33 }
  0xe7   : > { %1187 = vmatmul.msk.bf16.gmra.mxu0 %vm714_vm4, %v659_v14  ;;  %v830_v40 = vrot.slane %v659_v14, 1  ;;  %v670_v43 = vshll.u32 %v659_v14, 16  ;;  %v615_v11 = vmax.f32 %v607_v39, 0.0  ;;  %v674_v3 = vshrl.u32 %v659_v14, 16 }
  0xe8   : > { %v571_v44 = vpop.f32.mrf.mxu2 }
  0xe9   : > { %v584_v46 = vadd.f32 %v571_v44, %v490_v37  ;;  %v831_v13 = vsel %vm506_vm2, %v829_v38, %v830_v40  ;;  %v672_v48 = vrot.slane %v670_v43, 1  ;;  %v623_v54 = vpack.c.bf16 %v615_v11, %v615_v11 }
  0xea   : > { %1209 = vmatmul.msk.bf16.vlgmr.msrb.gmra.mxu1 %vm714_vm4, %v831_v13 }
  0xeb   : > { %v596_v49 = vmul.f32 %v1450_v35, %v584_v46  ;;  %v673_v50 = vsel %vm338_vm1, %v668_v47, %v672_v48  ;;  %v654_v61 = vunpack.c.l.b16 %v623_v54  ;;  %v676_v15 = vor.u32 %v674_v3, %v672_v48  ;;  %v1532_v46 = vld [vmem:[%s1584_s5] ss:$0 sm:$0xff] }
  0xec   : > { %1170 = vmatmul.msk.bf16.vlgmr.msrb.gmra.mxu3 %vm714_vm4, %v673_v50  ;;  %982 = vrot.lane.b32.xlu2 %v978_v25, %s1272_s18  ;;  %v1537_v47 = vld [vmem:[%s1585_s6] ss:$0 sm:$0xff] }
  0xed   : > { %v608_v52 = vadd.f32 %v1459_v41, %v596_v49 }
  0xef   : > { %v616_v55 = vmax.f32 %v608_v52, 0.0 }
  0xf0   : > { %v574_v57 = vpop.f32.mrf.mxu2 }
  0xf1   : > { %v624_v58 = vpack.c.bf16 %v616_v55, %v616_v55  ;;  %v585_v59 = vadd.f32 %v574_v57, %v493_v53 }
  0xf3   : > { %v655_v62 = vunpack.c.l.b16 %v624_v58  ;;  %v597_v63 = vmul.f32 %v1450_v35, %v585_v59 }
  0xf5   : > { %v660_v0 = vpack.c.b16 %v655_v62, %v654_v61  ;;  %v609_v18 = vadd.f32 %v1459_v41, %v597_v63 }
  0xf7   : > { %1188 = vmatmul.msk.bf16.gmra.mxu0 %vm714_vm4, %v660_v0  ;;  %v832_v16 = vrot.slane %v660_v0, 1  ;;  %v678_v4 = vshll.u32 %v660_v0, 16  ;;  %v617_v20 = vmax.f32 %v609_v18, 0.0 }
  0xf8   : > { %v576_v5 = vpop.f32.mrf.mxu2 }
  0xf9   : > { %v586_v10 = vadd.f32 %v576_v5, %v495_v1  ;;  %v833_v12 = vsel %vm506_vm2, %v830_v40, %v832_v16  ;;  %v680_v19 = vrot.slane %v678_v4, 1 }
  0xfa   : > { %1210 = vmatmul.msk.bf16.gmra.mxu1 %vm714_vm4, %v833_v12 }
  0xfb   : > { %v598_v27 = vmul.f32 %v1450_v35, %v586_v10  ;;  %v681_v21 = vsel %vm338_vm1, %v676_v15, %v680_v19  ;;  %v625_v35 = vpack.c.bf16 %v617_v20, %v617_v20 }
  0xfc   : > { %1171 = vmatmul.msk.bf16.gmra.mxu3 %vm714_vm4, %v681_v21 }
  0xfd   : > { %v610_v26 = vadd.f32 %v1459_v41, %v598_v27  ;;  %v656_v9 = vunpack.c.l.b16 %v625_v35  ;;  %v682_v41 = vshrl.u32 %v660_v0, 16 }
  0xff   : > { %v618_v30 = vmax.f32 %v610_v26, 0.0  ;;  %v684_v34 = vor.u32 %v682_v41, %v680_v19 }
 0x101   : > { %v626_v8 = vpack.c.bf16 %v618_v30, %v618_v30 }
 0x103   : > { %v657_v31 = vunpack.c.l.b16 %v626_v8 }
 0x105   : > { %v661_v6 = vpack.c.b16 %v657_v31, %v656_v9 }
 0x107   : > { %1189 = vmatmul.msk.bf16.gmra.mxu0 %vm714_vm4, %v661_v6  ;;  %v834_v7 = vrot.slane %v661_v6, 1  ;;  %v686_v32 = vshll.u32 %v661_v6, 16  ;;  %v690_v2 = vshrl.u32 %v661_v6, 16 }
 0x109   : > { %v835_v33 = vsel %vm506_vm2, %v832_v16, %v834_v7  ;;  %v688_v14 = vrot.slane %v686_v32, 1 }
 0x10a   : > { %1211 = vmatmul.msk.bf16.gmra.mxu1 %vm714_vm4, %v835_v33 }
 0x10b   : > { %v689_v36 = vsel %vm338_vm1, %v684_v34, %v688_v14  ;;  %v692_v37 = vor.u32 %v690_v2, %v688_v14 }
 0x10c   : > { %1172 = vmatmul.msk.bf16.gmra.mxu3 %vm714_vm4, %v689_v36 }
 0x119   : > { %v948_v49 = vpop.permute.xlu0 %947 }
 0x11a   : > { %1212 = vmatmul.msk.bf16.gmra.mxu1 %vm714_vm4, %v834_v7 }
 0x11c   : > { %1173 = vmatmul.msk.bf16.gmra.mxu3 %vm714_vm4, %v692_v37 }
 0x13d   : > { %v967_v58 = vpop.permute.xlu1 %966 }
 0x13e   : > { %v981_v35 = vpop.permute.xlu2 %980 }
 0x146   : > { %v965_v4 = vpop.permute.xlu1 %964  ;;  %v983_v34 = vpop.permute.xlu2 %982 }
 0x154   : > { %v801_v38 = vpop.f32.mrf.mxu0 }
 0x15c   : > { %v803_v40 = vpop.f32.mrf.mxu0 }
 0x164   : > { %v806_v11 = vpop.f32.mrf.mxu0 }
 0x167   : > { %v881_v39 = vpop.f32.mrf.mxu1 }
 0x16c   : > { %v808_v60 = vpop.f32.mrf.mxu0 }
 0x16f   : > { %v740_v43 = vpop.f32.mrf.mxu3  ;;  %v883_v44 = vpop.f32.mrf.mxu1 }
 0x170   : > { %v802_v45 = vadd.f32 %v801_v38, %v740_v43  ;;  %v997_v43 = vpop.permute.xlu0 %996 }
 0x172   : > { %v901_v13 = vadd.f32 %v881_v39, %v802_v45 }
 0x174   : > { %v913_v48 = vmul.f32 %v1532_v46, %v901_v13  ;;  %v811_v12 = vpop.f32.mrf.mxu0 }
 0x176   : > { %v925_v50 = vadd.f32 %v1537_v47, %v913_v48 }
 0x177   : > { %v742_v51 = vpop.f32.mrf.mxu3  ;;  %v886_v52 = vpop.f32.mrf.mxu1 }
 0x178   : > { %v804_v53 = vadd.f32 %v803_v40, %v742_v51  ;;  %v933_v54 = vmax.f32 %v925_v50, 0.0 }
 0x17a   : > { %v902_v55 = vadd.f32 %v883_v44, %v804_v53  ;;  %v953_v56 = vadd.f32 %v948_v49, %v933_v54  ;;  %v999_v54 = vpop.permute.xlu1 %998 }
 0x17c   : > { %v914_v57 = vmul.f32 %v1532_v46, %v902_v55  ;;  %956 = vst.msk [vmem:[%s1544_s28] sm:$0xff] %vm955_vm6, %v953_v56  ;;  %v813_v28 = vpop.f32.mrf.mxu0 }
 0x17e   : > { %v926_v59 = vadd.f32 %v1537_v47, %v914_v57 }
 0x17f   : > { %v745_v61 = vpop.f32.mrf.mxu3  ;;  %v888_v17 = vpop.f32.mrf.mxu1 }
 0x180   : > { %v934_v62 = vmax.f32 %v926_v59, 0.0  ;;  %v807_v63 = vadd.f32 %v806_v11, %v745_v61 }
 0x182   : > { %v954_v0 = vadd.f32 %v950_v42, %v934_v62  ;;  %v903_v1 = vadd.f32 %v886_v52, %v807_v63 }
 0x184   : > { %v915_v18 = vmul.f32 %v1532_v46, %v903_v1  ;;  %958 = vst.msk [vmem:[%s1544_s28 + $0x8] sm:$0xf] %vm957_vm7, %v954_v0  ;;  %v816_v33 = vpop.f32.mrf.mxu0 }
 0x186   : > { %v927_v16 = vadd.f32 %v1537_v47, %v915_v18 }
 0x187   : > { %v747_v3 = vpop.f32.mrf.mxu3  ;;  %v891_v20 = vpop.f32.mrf.mxu1 }
 0x188   : > { %v809_v5 = vadd.f32 %v808_v60, %v747_v3  ;;  %v935_v10 = vmax.f32 %v927_v16, 0.0 }
 0x18a   : > { %v904_v15 = vadd.f32 %v888_v17, %v809_v5  ;;  %v970_v19 = vadd.f32 %v965_v4, %v935_v10 }
 0x18c   : > { %v916_v27 = vmul.f32 %v1532_v46, %v904_v15  ;;  %1213 = vst.msk [vmem:[%s1544_s28 + $0x10] sm:$0xff] %vm955_vm6, %v970_v19  ;;  %v818_v45 = vpop.f32.mrf.mxu0 }
 0x18e   : > { %v928_v21 = vadd.f32 %v1537_v47, %v916_v27 }
 0x18f   : > { %v750_v22 = vpop.f32.mrf.mxu3  ;;  %v893_v30 = vpop.f32.mrf.mxu1 }
 0x190   : > { %v936_v23 = vmax.f32 %v928_v21, 0.0  ;;  %v812_v24 = vadd.f32 %v811_v12, %v750_v22 }
 0x192   : > { %v971_v25 = vadd.f32 %v967_v58, %v936_v23  ;;  %v905_v26 = vadd.f32 %v891_v20, %v812_v24 }
 0x194   : > { %v917_v29 = vmul.f32 %v1532_v46, %v905_v26  ;;  %1214 = vst.msk [vmem:[%s1544_s28 + $0x18] sm:$0xf] %vm957_vm7, %v971_v25 }
 0x196   : > { %v929_v8 = vadd.f32 %v1537_v47, %v917_v29 }
 0x197   : > { %v752_v9 = vpop.f32.mrf.mxu3  ;;  %v896_v36 = vpop.f32.mrf.mxu1 }
 0x198   : > { %v814_v31 = vadd.f32 %v813_v28, %v752_v9  ;;  %v937_v6 = vmax.f32 %v929_v8, 0.0 }
 0x19a   : > { %v906_v7 = vadd.f32 %v893_v30, %v814_v31  ;;  %v986_v41 = vadd.f32 %v981_v35, %v937_v6 }
 0x19c   : > { %v918_v32 = vmul.f32 %v1532_v46, %v906_v7  ;;  %1215 = vst.msk [vmem:[%s1544_s28 + $0x20] sm:$0xff] %vm955_vm6, %v986_v41 }
 0x19e   : > { %v930_v14 = vadd.f32 %v1537_v47, %v918_v32 }
 0x19f   : > { %v755_v2 = vpop.f32.mrf.mxu3  ;;  %v898_v49 = vpop.f32.mrf.mxu1 }
 0x1a0   : > { %v817_v37 = vadd.f32 %v816_v33, %v755_v2  ;;  %v938_v38 = vmax.f32 %v930_v14, 0.0 }
 0x1a2   : > { %v907_v39 = vadd.f32 %v896_v36, %v817_v37  ;;  %v987_v40 = vadd.f32 %v983_v34, %v938_v38 }
 0x1a4   : > { %v919_v42 = vmul.f32 %v1532_v46, %v907_v39  ;;  %1216 = vst.msk [vmem:[%s1544_s28 + $0x28] sm:$0xf] %vm957_vm7, %v987_v40 }
 0x1a6   : > { %v931_v44 = vadd.f32 %v1537_v47, %v919_v42 }
 0x1a7   : > { %v757_v13 = vpop.f32.mrf.mxu3 }
 0x1a8   : > { %v819_v48 = vadd.f32 %v818_v45, %v757_v13  ;;  %v939_v11 = vmax.f32 %v931_v44, 0.0 }
 0x1aa   : > { %v908_v50 = vadd.f32 %v898_v49, %v819_v48  ;;  %v1002_v51 = vadd.f32 %v997_v43, %v939_v11 }
 0x1ac   : > { %v920_v52 = vmul.f32 %v1532_v46, %v908_v50  ;;  %1217 = vst.msk [vmem:[%s1544_s28 + $0x30] sm:$0xff] %vm955_vm6, %v1002_v51 }
 0x1ae   : > { %v932_v53 = vadd.f32 %v1537_v47, %v920_v52 }
 0x1b0   : > { %v940_v55 = vmax.f32 %v932_v53, 0.0 }
 0x1b2   : > { %v1003_v56 = vadd.f32 %v999_v54, %v940_v55 }
 0x1b4   : > { %1218 = vst.msk [vmem:[%s1544_s28 + $0x38] sm:$0xf] %vm957_vm7, %v1003_v56 }
 0x1b5 PF: > { %s17_s24 = sadd.s32 1, %s1270_s24  }
 0x1b6   : > { %p14_p5 = scmp.ge.s32.totalorder %s17_s24, 4  }
 0x1b8   :  { %16 = sbr.rel (!%p14_p5) target bundleno = 1 (0x1), region = 85 }

</bundles_post_ra>
